<compile_context>
chip_gen: v7x
topology: tpu7x:2x2x1
jax: 0.10.0
libtpu: 0.0.40
codegen_flags: <defaults>
</compile_context>

<pallas_src>
import jax
import jax.numpy as jnp
import numpy as np
from jax.experimental import pallas as pl
from jax.experimental.pallas import tpu as pltpu


def _round_up(x, m):
    return ((x + m - 1) // m) * m


def _choose_tile(n_pad, max_tile):
    """Largest multiple of 128 that divides n_pad and is <= max_tile."""
    best = 128
    d = 128
    limit = min(n_pad, max(128, max_tile))
    while d <= limit:
        if n_pad % d == 0:
            best = d
        d += 128
    return best


def _pos_embed_kernel(x_ref, w1_ref, s1_ref, w2_ref, b2_ref, o_ref):
    # x_ref block: (Bb, C_in, TILE_N) -- channels on sublanes, positions on lanes.
    block_b, c_in, _ = x_ref.shape

    w1 = w1_ref[...]                                  # (F_pad, C_in)
    s1 = s1_ref[...]                                  # (F_pad, 1)  BN + bias folded
    w2 = w2_ref[...]                                  # (F_pad, F_pad)
    b2 = b2_ref[...]                                  # (F_pad, 1)

    # Hoist the conv1 weight columns out of the batch loop.
    w1_cols = [w1[:, c:c + 1] for c in range(c_in)]   # each (F_pad, 1)

    for b in range(block_b):
        xt = x_ref[b]                                 # (C_in, TILE_N)

        # Conv1d(C_in -> F, k=1): K = 3-4 contraction done as an unrolled VPU
        # outer-product accumulate (MXU would pad K to 128/256).
        acc = w1_cols[0] * xt[0:1, :]                 # (F_pad, TILE_N)
        for c in range(1, c_in):
            acc = acc + w1_cols[c] * xt[c:c + 1, :]
        h = jnp.maximum(acc + s1, 0.0)                # BN (eval) + bias + ReLU

        # Conv1d(F -> F, k=1) on the MXU, fp32 accumulate.
        y = jnp.dot(w2, h, preferred_element_type=jnp.float32)
        o_ref[b] = (y + b2).astype(o_ref.dtype)


def position_embedding_learned(xyz, params, *, max_tile_n=8192):
    """xyz: (B, N, C_in) float32. Returns (B, F, N) to match PyTorch."""
    B, N, C_in = xyz.shape
    w1, b1 = params["w1"], params["b1"]            # w1: (F, C_in)
    w2, b2 = params["w2"], params["b2"]            # w2: (F, F)
    F = w1.shape[0]

    # Fold BatchNorm (eval) into conv1 weight / bias.
    bn_scale = params["gamma"] * jax.lax.rsqrt(params["run_var"] + params["eps"])
    bn_shift = params["beta"] - params["run_mean"] * bn_scale
    w1f = w1 * bn_scale[:, None]                   # (F, C_in)
    s1 = b1 * bn_scale + bn_shift                  # (F,)

    # F only needs sublane (8) alignment; positions are the lane axis.
    F_pad = _round_up(F, 8)

    # Pad positions only to a lane multiple (no tile-sized over-padding), then
    # pick the tile as a divisor of N_pad so no wasted columns are written.
    N_pad = _round_up(N, 128)

    # Cap the tile so double-buffered in/out blocks plus the fp32 intermediates
    # stay well inside scoped VMEM (also safe on v7x's 64 MiB physical VMEM).
    bytes_per_col = 4 * (2 * (C_in + F_pad) + 2 * F_pad)
    vmem_budget = 16 * 1024 * 1024
    tile_cap = max(128, (vmem_budget // bytes_per_col) // 128 * 128)
    tile_n = _choose_tile(N_pad, min(max_tile_n, tile_cap))
    num_j = N_pad // tile_n

    # v7x megacore: keep at least 2 grid steps when B == 1 and N allows a split.
    if B * num_j < 2 and N_pad >= 256:
        tile_n = _choose_tile(N_pad, N_pad // 2)
        num_j = N_pad // tile_n

    # Small-N path: if the whole position range is a single tile, fold part of
    # the batch into each block to fatten per-step bytes, while keeping >= 2
    # grid steps so both v7x TensorCores stay busy.
    block_b = 1
    if num_j == 1 and B > 1:
        per_b_bytes = (C_in + 3 * F_pad) * tile_n * 4
        budget = 8 * 1024 * 1024
        for cand in range(B, 0, -1):
            if B % cand:
                continue
            if B // cand >= 2 and cand * per_b_bytes <= budget:
                block_b = cand
                break

    grid = (B // block_b, num_j)

    # Channels-first input, matching what Conv1d consumes (tiny transpose: C_in=3..4).
    xt = jnp.transpose(xyz, (0, 2, 1))                             # (B, C_in, N)
    if N_pad != N:
        xt = jnp.pad(xt, ((0, 0), (0, 0), (0, N_pad - N)))

    # Padded F rows stay exactly 0 through ReLU and zero-padded W2 rows/cols.
    w1f_p = jnp.pad(w1f, ((0, F_pad - F), (0, 0)))                 # (F_pad, C_in)
    s1_p = jnp.pad(s1, (0, F_pad - F)).reshape(F_pad, 1)           # (F_pad, 1)
    w2_p = jnp.pad(w2, ((0, F_pad - F), (0, F_pad - F)))           # (F_pad, F_pad)
    b2_p = jnp.pad(b2, (0, F_pad - F)).reshape(F_pad, 1)           # (F_pad, 1)

    flops = 2 * B * N_pad * F_pad * (C_in + F_pad)
    bytes_accessed = 4 * (xt.size + B * F_pad * N_pad
                          + w1f_p.size + s1_p.size + w2_p.size + b2_p.size)
    cost = pl.CostEstimate(flops=flops, transcendentals=0,
                           bytes_accessed=bytes_accessed)

    out = pl.pallas_call(
        _pos_embed_kernel,
        out_shape=jax.ShapeDtypeStruct((B, F_pad, N_pad), jnp.float32),
        grid_spec=pl.GridSpec(
            grid=grid,
            in_specs=[
                pl.BlockSpec((block_b, C_in, tile_n), lambda i, j: (i, 0, j)),  # x (transposed)
                pl.BlockSpec((F_pad, C_in),           lambda i, j: (0, 0)),     # W1 (BN folded)
                pl.BlockSpec((F_pad, 1),              lambda i, j: (0, 0)),     # fused shift
                pl.BlockSpec((F_pad, F_pad),          lambda i, j: (0, 0)),     # W2
                pl.BlockSpec((F_pad, 1),              lambda i, j: (0, 0)),     # b2
            ],
            out_specs=pl.BlockSpec((block_b, F_pad, tile_n), lambda i, j: (i, 0, j)),
        ),
        compiler_params=pltpu.CompilerParams(
            dimension_semantics=("parallel", "parallel"),
            vmem_limit_bytes=32 * 1024 * 1024,
        ),
        cost_estimate=cost,
    )(xt, w1f_p, s1_p, w2_p, b2_p)

    # Output is already in PyTorch's (B, F, N) orientation; drop padding (no-op
    # when F, N are already aligned).
    return out[:, :F, :N]


def _reference(xyz, params):
    """Pure-JAX reference of the same forward pass."""
    w1, b1 = params["w1"], params["b1"]
    w2, b2 = params["w2"], params["b2"]
    scale = params["gamma"] / jnp.sqrt(params["run_var"] + params["eps"])
    shift = params["beta"] - params["run_mean"] * scale
    h = jnp.einsum("bnc,fc->bnf", xyz, w1) + b1
    h = jnp.maximum(h * scale + shift, 0.0)
    y = jnp.einsum("bnf,gf->bng", h, w2) + b2
    return jnp.transpose(y, (0, 2, 1))


def _make_params(key, c_in, num_pos_feats):
    k1, k2, k3, k4, k5, k6 = jax.random.split(key, 6)
    F = num_pos_feats
    params = {
        "w1": jax.random.normal(k1, (F, c_in), jnp.float32) * 0.1,   # Conv1d weight (F, C_in)
        "b1": jax.random.normal(k2, (F,), jnp.float32) * 0.1,
        "gamma": 1.0 + 0.05 * jax.random.normal(k3, (F,), jnp.float32),
        "beta": 0.05 * jax.random.normal(k4, (F,), jnp.float32),
        "run_mean": 0.02 * jax.random.normal(k5, (F,), jnp.float32),
        "run_var": jnp.ones((F,), jnp.float32),
        "eps": jnp.float32(1e-5),
        "w2": jax.random.normal(k6, (F, F), jnp.float32) * 0.1,      # Conv1d weight (F, F)
        "b2": jnp.zeros((F,), jnp.float32),
    }
    return params


if __name__ == "__main__":
    B, N, C_IN, NUM_POS_FEATS = 2, 16, 4, 32

    key = jax.random.PRNGKey(0)
    kx, kp = jax.random.split(key)
    xyz = jax.random.normal(kx, (B, N, C_IN), jnp.float32)   # (B, N, input_channel)
    params = _make_params(kp, C_IN, NUM_POS_FEATS)

    out = jax.block_until_ready(position_embedding_learned(xyz, params))  # (B, F, N)
    ref = jax.block_until_ready(_reference(xyz, params))

    np.testing.assert_allclose(np.asarray(out), np.asarray(ref), rtol=1e-5, atol=1e-5)
    assert out.shape == (B, NUM_POS_FEATS, N)

    print("KERNEL_OK")
</pallas_src>

<mosaic_0001>
module attributes {stable_mosaic.version = 11 : i64} {
  func.func @_pos_embed_kernel(%arg0: i32, %arg1: i32, %arg2: memref<1x4x128xf32, #tpu.memory_space<vmem>>, %arg3: memref<32x4xf32, #tpu.memory_space<vmem>>, %arg4: memref<32x1xf32, #tpu.memory_space<vmem>>, %arg5: memref<32x32xf32, #tpu.memory_space<vmem>>, %arg6: memref<32x1xf32, #tpu.memory_space<vmem>>, %arg7: memref<1x32x128xf32, #tpu.memory_space<vmem>>) attributes {dimension_semantics = [#tpu.dimension_semantics<parallel>, #tpu.dimension_semantics<parallel>], iteration_bounds = array<i64: 2, 1>, scalar_prefetch = 0 : i64, scratch_operands = 0 : i64, tpu.core_type = #tpu.core_type<tc>, window_params = [{transform_indices = @transform_0, window_bounds = array<i64: 1, 4, 128>}, {pipeline_mode = #tpu.pipeline_mode<synchronous>, transform_indices = @transform_1, window_bounds = array<i64: 32, 4>}, {pipeline_mode = #tpu.pipeline_mode<synchronous>, transform_indices = @transform_2, window_bounds = array<i64: 32, 1>}, {pipeline_mode = #tpu.pipeline_mode<synchronous>, transform_indices = @transform_3, window_bounds = array<i64: 32, 32>}, {pipeline_mode = #tpu.pipeline_mode<synchronous>, transform_indices = @transform_4, window_bounds = array<i64: 32, 1>}, {transform_indices = @transform_5, window_bounds = array<i64: 1, 32, 128>}]} {
    %c0 = arith.constant 0 : index
    %c0_0 = arith.constant 0 : index
    %0 = vector.load %arg3[%c0, %c0_0] : memref<32x4xf32, #tpu.memory_space<vmem>>, vector<32x4xf32>
    %c0_1 = arith.constant 0 : index
    %c0_2 = arith.constant 0 : index
    %1 = vector.load %arg4[%c0_1, %c0_2] : memref<32x1xf32, #tpu.memory_space<vmem>>, vector<32x1xf32>
    %c0_3 = arith.constant 0 : index
    %c0_4 = arith.constant 0 : index
    %2 = vector.load %arg5[%c0_3, %c0_4] : memref<32x32xf32, #tpu.memory_space<vmem>>, vector<32x32xf32>
    %c0_5 = arith.constant 0 : index
    %c0_6 = arith.constant 0 : index
    %3 = vector.load %arg6[%c0_5, %c0_6] : memref<32x1xf32, #tpu.memory_space<vmem>>, vector<32x1xf32>
    %4 = vector.extract_strided_slice %0 {offsets = [0, 0], sizes = [32, 1], strides = [1, 1]} : vector<32x4xf32> to vector<32x1xf32>
    %5 = vector.extract_strided_slice %0 {offsets = [0, 1], sizes = [32, 1], strides = [1, 1]} : vector<32x4xf32> to vector<32x1xf32>
    %6 = vector.extract_strided_slice %0 {offsets = [0, 2], sizes = [32, 1], strides = [1, 1]} : vector<32x4xf32> to vector<32x1xf32>
    %7 = vector.extract_strided_slice %0 {offsets = [0, 3], sizes = [32, 1], strides = [1, 1]} : vector<32x4xf32> to vector<32x1xf32>
    %c0_7 = arith.constant 0 : index
    %c0_8 = arith.constant 0 : index
    %c0_9 = arith.constant 0 : index
    %8 = vector.load %arg2[%c0_7, %c0_8, %c0_9] : memref<1x4x128xf32, #tpu.memory_space<vmem>>, vector<1x4x128xf32>
    %9 = vector.shape_cast %8 : vector<1x4x128xf32> to vector<4x128xf32>
    %10 = vector.extract_strided_slice %9 {offsets = [0, 0], sizes = [1, 128], strides = [1, 1]} : vector<4x128xf32> to vector<1x128xf32>
    %11 = vector.broadcast %4 : vector<32x1xf32> to vector<32x128xf32>
    %12 = vector.broadcast %10 : vector<1x128xf32> to vector<32x128xf32>
    %13 = arith.mulf %11, %12 : vector<32x128xf32>
    %14 = vector.extract_strided_slice %9 {offsets = [1, 0], sizes = [1, 128], strides = [1, 1]} : vector<4x128xf32> to vector<1x128xf32>
    %15 = vector.broadcast %5 : vector<32x1xf32> to vector<32x128xf32>
    %16 = vector.broadcast %14 : vector<1x128xf32> to vector<32x128xf32>
    %17 = arith.mulf %15, %16 : vector<32x128xf32>
    %18 = arith.addf %13, %17 : vector<32x128xf32>
    %19 = vector.extract_strided_slice %9 {offsets = [2, 0], sizes = [1, 128], strides = [1, 1]} : vector<4x128xf32> to vector<1x128xf32>
    %20 = vector.broadcast %6 : vector<32x1xf32> to vector<32x128xf32>
    %21 = vector.broadcast %19 : vector<1x128xf32> to vector<32x128xf32>
    %22 = arith.mulf %20, %21 : vector<32x128xf32>
    %23 = arith.addf %18, %22 : vector<32x128xf32>
    %24 = vector.extract_strided_slice %9 {offsets = [3, 0], sizes = [1, 128], strides = [1, 1]} : vector<4x128xf32> to vector<1x128xf32>
    %25 = vector.broadcast %7 : vector<32x1xf32> to vector<32x128xf32>
    %26 = vector.broadcast %24 : vector<1x128xf32> to vector<32x128xf32>
    %27 = arith.mulf %25, %26 : vector<32x128xf32>
    %28 = arith.addf %23, %27 : vector<32x128xf32>
    %29 = vector.broadcast %1 : vector<32x1xf32> to vector<32x128xf32>
    %30 = arith.addf %28, %29 : vector<32x128xf32>
    %cst = arith.constant 0.000000e+00 : f32
    %31 = vector.broadcast %cst : f32 to vector<32x128xf32>
    %32 = arith.maximumf %30, %31 : vector<32x128xf32>
    %cst_10 = arith.constant dense<0.000000e+00> : vector<32x128xf32>
    %33 = tpu.matmul %2, %32, %cst_10 {dimension_numbers = #tpu.dot_dimension_numbers<[1], [0], [0], [1], [0, 0, 1, 1], [], []>} : vector<32x32xf32>, vector<32x128xf32>, vector<32x128xf32> -> vector<32x128xf32>
    %34 = vector.broadcast %3 : vector<32x1xf32> to vector<32x128xf32>
    %35 = arith.addf %33, %34 : vector<32x128xf32>
    %c0_11 = arith.constant 0 : index
    %c0_12 = arith.constant 0 : index
    %c0_13 = arith.constant 0 : index
    %36 = vector.load %arg7[%c0_11, %c0_12, %c0_13] : memref<1x32x128xf32, #tpu.memory_space<vmem>>, vector<1x32x128xf32>
    %37 = vector.shape_cast %36 : vector<1x32x128xf32> to vector<32x128xf32>
    %38 = vector.shape_cast %35 : vector<32x128xf32> to vector<1x32x128xf32>
    tpu.vector_store %arg7[%c0_11, %c0_12, %c0_13], %38 {strides = array<i32>} : memref<1x32x128xf32, #tpu.memory_space<vmem>>, vector<1x32x128xf32>,
    return
  }
  func.func @transform_0(%arg0: i32, %arg1: i32) -> (i32, i32, i32) {
    %c0_i32 = arith.constant 0 : i32
    %c0_i32_0 = arith.constant 0 : i32
    return %arg0, %c0_i32, %arg1 : i32, i32, i32
  }
  func.func @transform_1(%arg0: i32, %arg1: i32) -> (i32, i32) {
    %c0_i32 = arith.constant 0 : i32
    %c0_i32_0 = arith.constant 0 : i32
    %c0_i32_1 = arith.constant 0 : i32
    return %c0_i32, %c0_i32_0 : i32, i32
  }
  func.func @transform_2(%arg0: i32, %arg1: i32) -> (i32, i32) {
    %c0_i32 = arith.constant 0 : i32
    %c0_i32_0 = arith.constant 0 : i32
    %c0_i32_1 = arith.constant 0 : i32
    return %c0_i32, %c0_i32_0 : i32, i32
  }
  func.func @transform_3(%arg0: i32, %arg1: i32) -> (i32, i32) {
    %c0_i32 = arith.constant 0 : i32
    %c0_i32_0 = arith.constant 0 : i32
    %c0_i32_1 = arith.constant 0 : i32
    return %c0_i32, %c0_i32_0 : i32, i32
  }
  func.func @transform_4(%arg0: i32, %arg1: i32) -> (i32, i32) {
    %c0_i32 = arith.constant 0 : i32
    %c0_i32_0 = arith.constant 0 : i32
    %c0_i32_1 = arith.constant 0 : i32
    return %c0_i32, %c0_i32_0 : i32, i32
  }
  func.func @transform_5(%arg0: i32, %arg1: i32) -> (i32, i32, i32) {
    %c0_i32 = arith.constant 0 : i32
    %c0_i32_0 = arith.constant 0 : i32
    return %arg0, %c0_i32, %arg1 : i32, i32, i32
  }
}

</mosaic_0001>

<bundles_post_ra>
// kernel: tpu_custom_call.1
= control target key start
LH: loop header
LB: loop body
LE: loop exit
PB: predicated region body
PF: predicated region fallthrough
CT: control target
= control target key end

     0   :  { %10 = vsyncpa [#allocation3], 0  ;;  %s1021_s0 = inlined_call_operand.vmem [shape: f32[2,4,128], index: 0, kind: input, shape index: {}]   ;;  %s1022_s1 = inlined_call_operand.vmem [shape: f32[32,4], index: 1, kind: input, shape index: {}]   ;;  %s1023_s2 = inlined_call_operand.vmem [shape: f32[32,1], index: 2, kind: input, shape index: {}]   ;;  %s1024_s3 = inlined_call_operand.vmem [shape: f32[32,32], index: 3, kind: input, shape index: {}]   ;;  %s1025_s4 = inlined_call_operand.vmem [shape: f32[32,1], index: 4, kind: input, shape index: {}]   ;;  %s1026_s5 = inlined_call_operand.hbm [shape: f32[2,32,128], index: 5, kind: output, shape index: {}]  }
   0x1   :  { %12 = vsyncpa [#allocation3 + $0x1], 0  ;;  %s854_s18 = smov 0   ;;  %s856_s19 = smov 0  }
   0x2   :  { %s858_s20 = smov 0   ;;  %s860_s21 = smov 0  }
   0x3   :  { %s862_s22 = smov 0   ;;  %s864_s23 = smov 0  }
   0x4 LB: > { %s614_s24 = sadd.s32 4294967295, %s815_s23   ;;  %s615_s25 = sadd.s32 4294967294, %s815_s23   ;;  %s815_s23 = sphi %s864_s23, %s18_s23   ;;  %s811_s22 = sphi %s862_s22, %s1033_s22   ;;  %s807_s21 = sphi %s860_s21, %s1032_s21   ;;  %s803_s20 = sphi %s858_s20, %s1031_s20   ;;  %s799_s19 = sphi %s856_s19, %s1030_s19   ;;  %s795_s18 = sphi %s854_s18, %s1029_s18  }
   0x5   : > { %s30_s26 = sadd.s32 1, %s811_s22  ;;  %s151_s27 = sadd.s32 1, %s803_s20 }
   0x6   : > { %p32_p0 = scmp.ge.s32.totalorder %s30_s26, 2  ;;  %p161_p1 = scmp.ne.s32.totalorder %s803_s20, %s799_s19 }
   0x7   : > { %p162_p2 = scmp.eq.s32.totalorder %s614_s24, 1  ;;  %p167_p3 = scmp.ne.s32.totalorder %s799_s19, %s795_s18 }
   0x8   : > { %s1035_s26 = smov (%p32_p0, %s30_s26), 0  ;;  %p168_p5 = scmp.eq.s32.totalorder %s615_s25, 1 }
   0x9   : > { %p894_p4 = por %p162_p2, %p161_p1  ;;  %s146_s29 = ssub.s32 %s811_s22, %s1035_s26 }
   0xa   : > { %p618_p6 = scmp.ge.s32.totalorder %s815_s23, 1  ;;  %p149_p7 = scmp.eq.s32.totalorder %s146_s29, 0 }
   0xb   : > { %p901_p8 = por %p168_p5, %p167_p3  ;;  %p208_p9 = scmp.lt.s32.totalorder %s815_s23, 3 }
   0xc   : > { %s907_s6 = scalar_select %p149_p7, %s803_s20, %s151_s27  }
   0xd   : > { %p209_p10 = pnand %p618_p6, %p208_p9 }
   0xe   : > { %v245_v0 = vld [vmem:[%s1022_s1] sm:$0xff] (!%p209_p10)  ;;  %v817_v1 = vmov (!%p209_p10), 3   ;;  %v818_v2 = vmov (!%p209_p10), 1   ;;  %v246_v3 = vld [vmem:[%s1022_s1 + $0x8] sm:$0xff] (!%p209_p10)  ;;  %v819_v4 = vmov (!%p209_p10), 2   ;;  %v248_v5 = vld [vmem:[%s1022_s1 + $0x18] sm:$0xff] (!%p209_p10)  ;;  %v282_v25 = vlaneseq (!%p209_p10) }
   0xf   : > { %212 = sbr.rel (%p209_p10) target bundleno = 435 (0x1b3), region = 40  ;;  %730 = vset.pattern.permute.xlu0 (!%p209_p10), %v817_v1  ;;  %726 = vset.pattern.permute.xlu1 (!%p209_p10), %v818_v2  ;;  %v247_v6 = vld [vmem:[%s1022_s1 + $0x10] sm:$0xff] (!%p209_p10)  ;;  %v820_v7 = vmov (!%p209_p10), 0   ;;  %v249_v8 = vld [vmem:[%s1023_s2] sm:$0xff] (!%p209_p10)  ;;  %v252_v9 = vld [vmem:[%s1023_s2 + $0x18] sm:$0xff] (!%p209_p10)  ;;  %vm422_vm0 = vcmask (!%p209_p10), 261120  }
  0x10   : > { %347 = vperm.xlu0 (!%p209_p10), %730, %v245_v0   ;;  %291 = vperm.xlu1 (!%p209_p10), %726, %v245_v0   ;;  %v258_v10 = vld [vmem:[%s1025_s4 + $0x8] sm:$0xff] (!%p209_p10)  ;;  %v260_v11 = vld [vmem:[%s1025_s4 + $0x18] sm:$0xff] (!%p209_p10)  ;;  %v251_v13 = vld [vmem:[%s1023_s2 + $0x10] sm:$0xff] (!%p209_p10)  ;;  %p238_p11 = scmp.lt.s32.totalorder (!%p209_p10), %s807_s21, 1  ;;  %v283_v28 = vshrl.u32 (!%p209_p10), %v282_v25, 7  ;;  %s235_s14 = sand.u32 (!%p209_p10), 1, %s799_s19  }
  0x11   : > { %v250_v12 = vld [vmem:[%s1023_s2 + $0x8] sm:$0xff] (!%p209_p10)  ;;  %v257_v14 = vld [vmem:[%s1025_s4] sm:$0xff] (!%p209_p10)  ;;  %v259_v15 = vld [vmem:[%s1025_s4 + $0x10] sm:$0xff] (!%p209_p10)  ;;  %s619_s15 = sshll.u32 (!%p209_p10), %s235_s14, 5  ;;  %s630_s24 = sshll.u32 (!%p209_p10), %s807_s21, 9 }
  0x12   : > { %v253_v16 = vld [vmem:[%s1024_s3] sm:$0xff] (!%p209_p10)  ;;  %v255_v17 = vld [vmem:[%s1024_s3 + $0x10] sm:$0xff] (!%p209_p10)  ;;  %v284_v30 = vsub.s32 (!%p209_p10), 0, %v283_v28  ;;  %v308_v31 = vsub.s32 (!%p209_p10), 1, %v283_v28  ;;  %v336_v36 = vsub.s32 (!%p209_p10), 2, %v283_v28  ;;  %v364_v38 = vsub.s32 (!%p209_p10), 3, %v283_v28 }
  0x13   : > { %647 = vmatprep.mubr.msk.f32.mxu0 (!%p209_p10), %vm422_vm0, %v253_v16  ;;  %650 = vmatprep.mubr.msk.f32.mxu1 (!%p209_p10), %vm422_vm0, %v255_v17  ;;  %s237_s16 = scalar_lea.vmem (!%p209_p10), [#allocation2], %s619_s15  ;;  %s821_s8 = smov (!%p209_p10), [#allocation2]  }
  0x14   : > { %731 = vset.pattern.permute.xlu0 (!%p209_p10), %v819_v4  ;;  %295 = vperm.xlu1 (!%p209_p10), %726, %v246_v3   ;;  %s539_s17 = sshll.u32 (!%p209_p10), %s237_s16, 4  ;;  %s968_s17 = int_to_ptr.vmem [resolvable:$true] %s539_s17 }
  0x15   : > { %319 = vperm.xlu0 (!%p209_p10), %731, %v245_v0   ;;  %s737_s7 = scalar_lea.vmem (!%p209_p10), %s968_s17, 512 }
  0x16   : > { %s239_s27 = scalar_select %p238_p11, %s807_s21, 1 }
  0x17   : > { %s975_s21 = scalar_lea.sflag [#allocation3], %s235_s14  ;;  %p738_p12 = scmp.ne.s32.totalorder %s968_s17, %s737_s7 }
  0x18   : > { %727 = vset.pattern.permute.xlu1 %v819_v4  ;;  %s620_s29 = sshll.u32 %s239_s27, 2 }
  0x19   : > { %331 = vperm.xlu0 %731, %v248_v5   ;;  %323 = vperm.xlu1 %727, %v246_v3   ;;  %s244_s9 = scalar_lea.vmem %s1021_s0, %s620_s29  ;;  %s973_s29 = scalar_lea.hbm %s1026_s5, %s630_s24 }
  0x1a   : > { %v261_v32 = vld [vmem:[%s244_s9] sm:$0xf]  ;;  %p739_p13 = pnand %p738_p12, %p894_p4  ;;  %s741_s9 = sshll.u32 %s821_s8, 4  ;;  %s742_s9 = int_to_ptr.vmem [resolvable:$false] %s741_s9 }
  0x1b   : > { %v285_v34 = vrot.slane %v261_v32, %v284_v30  ;;  %v309_v37 = vrot.slane %v261_v32, %v308_v31  ;;  %v337_v40 = vrot.slane %v261_v32, %v336_v36  ;;  %v365_v44 = vrot.slane %v261_v32, %v364_v38  ;;  %s743_s10 = scalar_lea.vmem %s742_s9, 1024  ;;  %p744_p1 = scmp.lt.s32.totalorder %s968_s17, %s742_s9 }
  0x1c   : > { %p740_p0 = pneg %p739_p13  ;;  %p745_p2 = scmp.lt.s32.totalorder %s743_s10, %s737_s7 }
  0x1d   : > { %734 = vset.pattern.permute.xlu0 %v820_v7  ;;  %728 = vset.pattern.permute.xlu1 %v820_v7 }
  0x1e   : > { %264 = vperm.xlu0 %734, %v245_v0   ;;  %274 = vperm.xlu1 %728, %v247_v6   ;;  %p746_p3 = por %p745_p2, %p744_p1 }
  0x20   : > { %p747_p5 = pnand %p746_p3, %p740_p0 }
  0x22   : > { %269 = vperm.xlu0 %734, %v246_v3   ;;  %729 = vset.pattern.permute.xlu1 %v818_v2 }
  0x23   : > { %299 = vperm.xlu1 %729, %v247_v6  }
  0x26   : > { %279 = vperm.xlu0 %734, %v248_v5  }
  0x27   : > { %303 = vperm.xlu1 %729, %v248_v5  }
  0x2a   : > { %376 = vperm.xlu0 %734, %v249_v8  }
  0x2b   : > { %732 = vset.pattern.permute.xlu1 %v817_v1 }
  0x2c   : > { %351 = vperm.xlu1 %732, %v246_v3  }
  0x2e   : > { %391 = vperm.xlu0 %734, %v252_v9  }
  0x30   : > { %733 = vset.pattern.permute.xlu1 %v819_v4 }
  0x31   : > { %327 = vperm.xlu1 %733, %v247_v6  }
  0x32   : > { %409 = vperm.xlu0 %734, %v258_v10  }
  0x35   : > { %735 = vset.pattern.permute.xlu1 %v817_v1 }
  0x36   : > { %419 = vperm.xlu0 %734, %v260_v11   ;;  %355 = vperm.xlu1 %735, %v247_v6  }
  0x3a   : > { %359 = vperm.xlu1 %735, %v248_v5  }
  0x3e   : > { %736 = vset.pattern.permute.xlu1 %v820_v7 }
  0x3f   : > { %381 = vperm.xlu1 %736, %v250_v12  }
  0x43   : > { %386 = vperm.xlu1 %736, %v251_v13  }
  0x47   : > { %404 = vperm.xlu1 %736, %v257_v14  }
  0x4b   : > { %414 = vperm.xlu1 %736, %v259_v15  }
  0x8f   : > { %v292_v18 = vpop.permute.xlu1 %291  ;;  %v348_v19 = vpop.permute.xlu0 %347 }
  0x90   : > { %v310_v43 = vmul.f32 %v309_v37, %v292_v18  ;;  %v366_v52 = vmul.f32 %v365_v44, %v348_v19 }
  0x93   : > { %v296_v20 = vpop.permute.xlu1 %295 }
  0x94   : > { %v320_v21 = vpop.permute.xlu0 %319  ;;  %v311_v50 = vmul.f32 %v309_v37, %v296_v20 }
  0x95   : > { %v338_v45 = vmul.f32 %v337_v40, %v320_v21 }
  0x98   : > { %v324_v22 = vpop.permute.xlu1 %323  ;;  %v332_v24 = vpop.permute.xlu0 %331 }
  0x99   : > { %v341_v53 = vmul.f32 %v337_v40, %v332_v24  ;;  %v339_v58 = vmul.f32 %v337_v40, %v324_v22  ;;  %v256_v24 = vld [vmem:[%s1024_s3 + $0x18] sm:$0xff] }
  0x9d   : > { %v275_v23 = vpop.permute.xlu1 %274  ;;  %v265_v27 = vpop.permute.xlu0 %264 }
  0x9e   : > { %v286_v39 = vmul.f32 %v285_v34, %v265_v27  ;;  %v288_v61 = vmul.f32 %v285_v34, %v275_v23  ;;  %v254_v23 = vld [vmem:[%s1024_s3 + $0x8] sm:$0xff] }
  0xa0   : > { %v314_v46 = vadd.f32 %v310_v43, %v286_v39 }
  0xa1   : > { %v270_v33 = vpop.permute.xlu0 %269 }
  0xa2   : > { %v300_v26 = vpop.permute.xlu1 %299  ;;  %v287_v47 = vmul.f32 %v285_v34, %v270_v33  ;;  %v342_v56 = vadd.f32 %v338_v45, %v314_v46 }
  0xa3   : > { %v312_v57 = vmul.f32 %v309_v37, %v300_v26 }
  0xa4   : > { %v315_v54 = vadd.f32 %v311_v50, %v287_v47  ;;  %v370_v0 = vadd.f32 %v366_v52, %v342_v56 }
  0xa5   : > { %v280_v41 = vpop.permute.xlu0 %279  ;;  %v316_v4 = vadd.f32 %v312_v57, %v288_v61 }
  0xa6   : > { %v304_v29 = vpop.permute.xlu1 %303  ;;  %v289_v48 = vmul.f32 %v285_v34, %v280_v41  ;;  %v343_v3 = vadd.f32 %v339_v58, %v315_v54 }
  0xa7   : > { %v313_v49 = vmul.f32 %v309_v37, %v304_v29 }
  0xa9   : > { %v317_v55 = vadd.f32 %v313_v49, %v289_v48  ;;  %v377_v62 = vpop.permute.xlu0 %376 }
  0xaa   : > { %v394_v5 = vadd.f32 %v377_v62, %v370_v0 }
  0xab   : > { %v352_v35 = vpop.permute.xlu1 %351  ;;  %v345_v2 = vadd.f32 %v341_v53, %v317_v55 }
  0xac   : > { %v367_v59 = vmul.f32 %v365_v44, %v352_v35  ;;  %v398_v13 = vmax.f32 %v394_v5, 0.0 }
  0xad   : > { %v392_v12 = vpop.permute.xlu0 %391 }
  0xae   : > { %v371_v8 = vadd.f32 %v367_v59, %v343_v3 }
  0xb0   : > { %v328_v42 = vpop.permute.xlu1 %327 }
  0xb1   : > { %v340_v1 = vmul.f32 %v337_v40, %v328_v42  ;;  %v410_v25 = vpop.permute.xlu0 %409 }
  0xb3   : > { %v344_v10 = vadd.f32 %v340_v1, %v316_v4 }
  0xb5   : > { %v356_v51 = vpop.permute.xlu1 %355  ;;  %v420_v27 = vpop.permute.xlu0 %419 }
  0xb6   : > { %v368_v6 = vmul.f32 %v365_v44, %v356_v51 }
  0xb8   : > { %v372_v16 = vadd.f32 %v368_v6, %v344_v10 }
  0xb9   : > { %v360_v60 = vpop.permute.xlu1 %359 }
  0xba   : > { %v369_v63 = vmul.f32 %v365_v44, %v360_v60 }
  0xbc   : > { %v373_v7 = vadd.f32 %v369_v63, %v345_v2 }
  0xbe   : > { %v382_v9 = vpop.permute.xlu1 %381  ;;  %v397_v14 = vadd.f32 %v392_v12, %v373_v7 }
  0xbf   : > { %v395_v11 = vadd.f32 %v382_v9, %v371_v8 }
  0xc0   : > { %v401_v21 = vmax.f32 %v397_v14, 0.0 }
  0xc1   : > { %v399_v15 = vmax.f32 %v395_v11, 0.0 }
  0xc2   : > { %v387_v17 = vpop.permute.xlu1 %386 }
  0xc3   : > { %v653_v18 = vpack.c.bf16 %v399_v15, %v398_v13  ;;  %v396_v19 = vadd.f32 %v387_v17, %v372_v16 }
  0xc5   : > { %v400_v20 = vmax.f32 %v396_v19, 0.0  ;;  %654 = vmatprep.subr.bf16.mxu0 %v653_v18  ;;  %661 = vmatprep.subr.bf16.mxu1 %v653_v18 }
  0xc6   : > { %656 = vmatpush3.bf16.msra.mxu0 %v653_v18  ;;  %663 = vmatpush3.bf16.msra.mxu1 %v653_v18  ;;  %v405_v26 = vpop.permute.xlu1 %404 }
  0xc7   : > { %v657_v22 = vpack.c.bf16 %v401_v21, %v400_v20 }
  0xc9   : > { %658 = vmatprep.subr.bf16.mxu0 %v657_v22  ;;  %662 = vmatprep.subr.bf16.mxu1 %v657_v22 }
  0xca   : > { %660 = vmatpush3.bf16.msra.mxu0 %v657_v22  ;;  %664 = vmatpush3.bf16.msra.mxu1 %v657_v22  ;;  %v415_v28 = vpop.permute.xlu1 %414 }
  0xcd   : > { %648 = vmatmul.mubr.msk.f32.vlgmr.msra.gmra.mrb[0].mxu0 %vm422_vm0, %v254_v23  ;;  %651 = vmatmul.mubr.msk.f32.vlgmr.msra.gmra.mrb[0].mxu1 %vm422_vm0, %v256_v24 }
 0x1a0   : > { %v649_v29 = vpop.f32.mrb[0].mxu0  ;;  %v652_v30 = vpop.f32.mrb[0].mxu1 }
 0x1a1   : > { %v507_v31 = vadd.f32 %v649_v29, %v410_v25  ;;  %v517_v32 = vadd.f32 %v652_v30, %v420_v27  ;;  %v501_v33 = vpop.f32.mrb[1].mxu0  ;;  %v511_v34 = vpop.f32.mrb[1].mxu1 }
 0x1a2   : > { %v502_v35 = vadd.f32 %v501_v33, %v405_v26  ;;  %v512_v36 = vadd.f32 %v511_v34, %v415_v28 }
 0x1a3   : > { %521 = vst [vmem:[%s237_s16 + $0x8] sm:$0xff] %v507_v31  ;;  %523 = vst [vmem:[%s237_s16 + $0x18] sm:$0xff] %v517_v32 }
 0x1a4   : > { %520 = vst [vmem:[%s237_s16] sm:$0xff] %v502_v35  ;;  %522 = vst [vmem:[%s237_s16 + $0x10] sm:$0xff] %v512_v36 }
 0x1a5   : > { %750 = shalt.err (!%p747_p5)
}
 0x1a6   : > { %s751_s11 = scalar_lea.hbm %s973_s29, 512  ;;  %s755_s14 = scalar_lea.hbm %s1026_s5, 1024 }
 0x1a7   : > { %p752_p6 = scmp.ne.s32.totalorder %s973_s29, %s751_s11  ;;  %p756_p10 = scmp.lt.u32.totalorder %s973_s29, %s1026_s5 }
 0x1a8   : > { %p757_p11 = scmp.lt.u32.totalorder %s755_s14, %s751_s11  ;;  %p759_p13 = scmp.lt.u32.totalorder %s751_s11, %s973_s29 }
 0x1a9   : > { %p753_p7 = pnand %p752_p6, %p894_p4 }
 0x1aa   : > { %p758_p12 = por %p757_p11, %p756_p10 }
 0x1ab   : > { %p754_p9 = pneg %p753_p7 }
 0x1ac   : > { %p760_p0 = por %p759_p13, %p758_p12 }
 0x1ae   : > { %p761_p1 = pnand %p760_p0, %p754_p9 }
 0x1b0   : > { %764 = shalt.err (!%p761_p1)
}
 0x1b1   : > { %s822_s24 = smov 128   ;;  %s823_s25 = smov 8  }
 0x1b2   : > { %665 = dma.vmem_to_hbm [thread:$0]  (%p894_p4), %s968_s17, 512, %s973_s29, %s975_s21, %s822_s24, %s822_s24, %s823_s25  }
 0x1b3 PF: > { %p671_p2 = scmp.ge.s32.totalorder %s815_s23, 2  ;;  %s554_s27 = sand.u32 1, %s795_s18  }
 0x1b4   : > { %s555_s7 = scalar_lea.sflag [#allocation3], %s554_s27 }
 0x1b5   : > { %p668_p3 = pnand %p671_p2, %p901_p8 }
 0x1b7   : > { %790 = dma.done.wait (!%p668_p3), %s555_s7, 512  }
 0x1b8   : > { %792 = vsyncadd (!%p668_p3), %s555_s7, 4294966784  ;;  %s18_s23 = sadd.s32 1, %s815_s23   ;;  %s1029_s18 = smov %s799_s19 }
 0x1b9   : > { %p15_p5 = scmp.ge.s32.totalorder %s18_s23, 4   ;;  %s1030_s19 = smov %s803_s20 }
 0x1ba   : > { %s1031_s20 = smov %s907_s6  ;;  %s1032_s21 = smov %s811_s22 }
 0x1bb   : > { %s1033_s22 = smov %s1035_s26  ;;  %17 = sbr.rel (!%p15_p5) target bundleno = 4 (0x4), region = 75 }
 0x1c2   :  { %560 = vsyncpa [#allocation3], 1 }
 0x1c3   :  { %562 = vsyncpa [#allocation3 + $0x1], 1 }

</bundles_post_ra>
